<compile_context>
chip_gen: v6e
topology: v6e:2x2x1
jax: 0.10.0
libtpu: 0.0.40
codegen_flags: <defaults>
</compile_context>

<pallas_src>
import jax
import jax.numpy as jnp
from jax.experimental import pallas as pl
from jax.experimental.pallas import tpu as pltpu


# ---------------------------------------------------------------------------
# Kernels
# ---------------------------------------------------------------------------

def _linear_kernel_single(x_ref, w_ref, o_ref):
    """Whole-K block: single MXU matmul, no accumulator, no branches."""
    x = x_ref[...].astype(w_ref.dtype)
    o_ref[...] = jnp.dot(
        x, w_ref[...], preferred_element_type=jnp.float32
    ).astype(o_ref.dtype)


def _linear_kernel_acc(x_ref, w_ref, o_ref, acc_ref):
    """K tiled on the last grid axis (requires >= 2 K steps): f32 VMEM accumulator."""
    k = pl.program_id(2)
    nk = pl.num_programs(2)

    x = x_ref[...].astype(w_ref.dtype)
    part = jnp.dot(x, w_ref[...], preferred_element_type=jnp.float32)

    @pl.when(k == 0)
    def _first():
        acc_ref[...] = part                    # no zero-fill + read-modify-write

    @pl.when((k > 0) & (k < nk - 1))
    def _middle():
        acc_ref[...] += part

    @pl.when(k == nk - 1)
    def _last():
        o_ref[...] = (acc_ref[...] + part).astype(o_ref.dtype)   # fused add + cast + store


# ---------------------------------------------------------------------------
# Helpers
# ---------------------------------------------------------------------------

def _round_up(v, m):
    return (v + m - 1) // m * m


def _vmem_budget():
    """(working-set budget bytes, scoped vmem_limit_bytes) per TPU generation."""
    try:
        cap = int(pltpu.get_tpu_info().vmem_capacity_bytes)
    except Exception:
        cap = 64 * 1024 * 1024  # conservative (v7x-sized) fallback
    if cap >= 128 * 1024 * 1024:          # v5e / v6e: 128 MiB physical VMEM
        budget = 80 * 1024 * 1024
    elif cap >= 64 * 1024 * 1024:         # v7x: 64 MiB physical per TensorCore
        budget = 26 * 1024 * 1024
    else:
        budget = max(cap // 4, 8 * 1024 * 1024)
    vmem_limit = min(int(cap * 3 // 4), budget + 32 * 1024 * 1024)
    vmem_limit = max(vmem_limit, budget + 4 * 1024 * 1024)
    return budget, vmem_limit


def _pick_tm(Mp):
    """Largest multiple-of-8 divisor of the (8-aligned) padded batch, capped at 256."""
    cap = min(Mp, 256)
    for t in range(cap, 7, -8):
        if Mp % t == 0:
            return t
    return 8


def _pick_tn(N):
    """Lane-dense output tiles; >= 2 tiles when N >= 256 so both v7x cores get work."""
    if N % 128 != 0:
        return N            # full-extent block (BlockSpec allows full dims)
    if N <= 128:
        return N
    if N <= 256:
        return 128          # 2 tiles at the demo shape
    if N % 256 == 0:
        return 256
    return 128


# ---------------------------------------------------------------------------
# Public API
# ---------------------------------------------------------------------------

def prepare_weight(W_init, dtype=jnp.bfloat16):
    """One-time, offline weight prep: PyTorch (out, in) -> (in, out), cast to bf16.

    Call once at model-load time; the per-call forward never touches W's layout again.
    """
    return jnp.asarray(W_init).T.astype(dtype)


@jax.jit
def inference_model_forward(x, w_t):
    """y = x @ W.T, with w_t = prepare_weight(W) of shape (in_features, out_features)."""
    M, K = x.shape
    K2, N = w_t.shape
    assert K == K2, "weight must be prepared with prepare_weight() -> shape (in, out)"

    out_dtype = x.dtype
    x_bytes = jnp.dtype(x.dtype).itemsize
    w_bytes = jnp.dtype(w_t.dtype).itemsize
    o_bytes = jnp.dtype(out_dtype).itemsize

    budget, vmem_limit = _vmem_budget()

    # Pad the batch only to a sublane multiple (8); sliced off at the end if needed.
    Mp = _round_up(M, 8)
    xp = x if Mp == M else jnp.pad(x, ((0, Mp - M), (0, 0)))

    tm = _pick_tm(Mp)
    tn = _pick_tn(N)

    def fits(tk, with_acc):
        b = 2 * tm * tk * x_bytes          # double-buffered x tiles
        b += 2 * tk * tn * w_bytes         # double-buffered W tiles
        b += 2 * tm * tn * o_bytes         # double-buffered output tiles
        b += tm * tk * w_bytes             # in-kernel bf16 cast temp of the x tile
        if with_acc:
            b += tm * tn * 4               # f32 accumulator scratch
        return b <= budget

    if fits(K, with_acc=False):
        # Fast path: whole-K blocks.  Grid (N tiles, M tiles) with M innermost so the
        # resident W panel is never re-fetched from HBM across M tiles.
        grid = (N // tn, Mp // tm)
        yp = pl.pallas_call(
            _linear_kernel_single,
            out_shape=jax.ShapeDtypeStruct((Mp, N), out_dtype),
            grid=grid,
            in_specs=[
                pl.BlockSpec((tm, K), lambda j, i: (i, 0)),
                pl.BlockSpec((K, tn), lambda j, i: (0, j)),
            ],
            out_specs=pl.BlockSpec((tm, tn), lambda j, i: (i, j)),
            compiler_params=pltpu.CompilerParams(
                dimension_semantics=("parallel", "parallel"),
                vmem_limit_bytes=vmem_limit,
            ),
        )(xp, w_t)
    else:
        # Large-K fallback: accumulate over the (last, "arbitrary") reduction axis in f32 VMEM.
        tk = None
        for cand in (4096, 2048, 1024, 512, 256, 128):
            if K % cand == 0 and fits(cand, with_acc=True):
                tk = cand
                break
        assert tk is not None, "no K tile fits VMEM (K must be a multiple of 128 for tiling)"
        assert K // tk >= 2  # _linear_kernel_acc assumes >= 2 reduction steps

        grid = (Mp // tm, N // tn, K // tk)
        yp = pl.pallas_call(
            _linear_kernel_acc,
            out_shape=jax.ShapeDtypeStruct((Mp, N), out_dtype),
            grid=grid,
            in_specs=[
                pl.BlockSpec((tm, tk), lambda i, j, k: (i, k)),
                pl.BlockSpec((tk, tn), lambda i, j, k: (k, j)),
            ],
            out_specs=pl.BlockSpec((tm, tn), lambda i, j, k: (i, j)),
            scratch_shapes=[pltpu.VMEM((tm, tn), jnp.float32)],
            compiler_params=pltpu.CompilerParams(
                dimension_semantics=("parallel", "parallel", "arbitrary"),
                vmem_limit_bytes=vmem_limit,
            ),
        )(xp, w_t)

    return yp if Mp == M else yp[:M]


# ---------------------------------------------------------------------------
# Demo / self-check
# ---------------------------------------------------------------------------

if __name__ == "__main__":
    # Small shapes consistent with the module: batch M = 16, feature dim D = 256.
    M, D = 16, 256
    key = jax.random.PRNGKey(0)
    kx, kw = jax.random.split(key)

    x = jax.random.normal(kx, (M, D), dtype=jnp.float32)
    # Deterministic synthetic W_init (the nn.Parameter of the Linear layer),
    # kept in PyTorch (out_features, in_features) layout.
    W_init = jax.random.normal(kw, (D, D), dtype=jnp.float32) * 0.02

    # One-time weight prep (offline transpose + bf16 cast), then the fast forward.
    w_t = prepare_weight(W_init)
    y = jax.block_until_ready(inference_model_forward(x, w_t))

    # Reference: nn.Linear(bias=False) => x @ W.T, using the same bf16-rounded operands
    # the MXU sees (products are exact in f32, accumulation is f32).
    x_q = x.astype(jnp.bfloat16).astype(jnp.float32)
    w_q = w_t.astype(jnp.float32)          # (K, N), already bf16-rounded
    y_ref = x_q @ w_q

    assert y.shape == (M, D)
    assert y.dtype == x.dtype
    assert jnp.allclose(y, y_ref, atol=1e-3, rtol=1e-3), "mismatch vs reference"

    print("KERNEL_OK")
</pallas_src>

<mosaic_0001>
module attributes {stable_mosaic.version = 11 : i64} {
  func.func @_linear_kernel_single(%arg0: i32, %arg1: i32, %arg2: memref<16x256xf32, #tpu.memory_space<vmem>>, %arg3: memref<256x128xbf16, #tpu.memory_space<vmem>>, %arg4: memref<16x128xf32, #tpu.memory_space<vmem>>) attributes {dimension_semantics = [#tpu.dimension_semantics<parallel>, #tpu.dimension_semantics<parallel>], iteration_bounds = array<i64: 2, 1>, scalar_prefetch = 0 : i64, scratch_operands = 0 : i64, tpu.core_type = #tpu.core_type<tc>, window_params = [{transform_indices = @transform_0, window_bounds = array<i64: 16, 256>}, {transform_indices = @transform_1, window_bounds = array<i64: 256, 128>}, {transform_indices = @transform_2, window_bounds = array<i64: 16, 128>}]} {
    %c0 = arith.constant 0 : index
    %c0_0 = arith.constant 0 : index
    %0 = vector.load %arg2[%c0, %c0_0] : memref<16x256xf32, #tpu.memory_space<vmem>>, vector<16x256xf32>
    %1 = arith.truncf %0 : vector<16x256xf32> to vector<16x256xbf16>
    %c0_1 = arith.constant 0 : index
    %c0_2 = arith.constant 0 : index
    %2 = vector.load %arg3[%c0_1, %c0_2] : memref<256x128xbf16, #tpu.memory_space<vmem>>, vector<256x128xbf16>
    %cst = arith.constant dense<0.000000e+00> : vector<16x128xf32>
    %3 = tpu.matmul %1, %2, %cst {dimension_numbers = #tpu.dot_dimension_numbers<[1], [0], [0], [1], [0, 0, 1, 1], [], []>} : vector<16x256xbf16>, vector<256x128xbf16>, vector<16x128xf32> -> vector<16x128xf32>
    %c0_3 = arith.constant 0 : index
    %c0_4 = arith.constant 0 : index
    %4 = vector.load %arg4[%c0_3, %c0_4] : memref<16x128xf32, #tpu.memory_space<vmem>>, vector<16x128xf32>
    tpu.vector_store %arg4[%c0_3, %c0_4], %3 {strides = array<i32>} : memref<16x128xf32, #tpu.memory_space<vmem>>, vector<16x128xf32>,
    return
  }
  func.func @transform_0(%arg0: i32, %arg1: i32) -> (i32, i32) {
    %c0_i32 = arith.constant 0 : i32
    %c0_i32_0 = arith.constant 0 : i32
    return %arg1, %c0_i32 : i32, i32
  }
  func.func @transform_1(%arg0: i32, %arg1: i32) -> (i32, i32) {
    %c0_i32 = arith.constant 0 : i32
    %c0_i32_0 = arith.constant 0 : i32
    return %c0_i32, %arg0 : i32, i32
  }
  func.func @transform_2(%arg0: i32, %arg1: i32) -> (i32, i32) {
    %c0_i32 = arith.constant 0 : i32
    return %arg1, %arg0 : i32, i32
  }
}

</mosaic_0001>

<bundles_post_ra>
// kernel: inference_model_forward.1
= control target key start
LH: loop header
LB: loop body
LE: loop exit
PB: predicated region body
PF: predicated region fallthrough
CT: control target
= control target key end

     0   :  { %7 = vsyncpa [#allocation3], 0  ;;  %s1002_s0 = inlined_call_operand.hbm [shape: f32[16,256], index: 0, kind: input, shape index: {}]   ;;  %s1003_s1 = inlined_call_operand.hbm [shape: bf16[256,256], index: 1, kind: input, shape index: {}]   ;;  %s1004_s2 = inlined_call_operand.hbm [shape: f32[16,256], index: 2, kind: output, shape index: {}]  }
   0x1   :  { %8 = vsyncpa [#allocation6], 0 }
   0x2   :  { %10 = vsyncpa [#allocation6 + $0x1], 0 }
   0x3   :  { %11 = vsyncpa [#allocation4], 0 }
   0x4   :  { %13 = vsyncpa [#allocation4 + $0x1], 0  ;;  %s808_s9 = smov 0   ;;  %s810_s10 = smov 0  }
   0x5   :  { %s812_s11 = smov 0   ;;  %s814_s12 = smov 0  }
   0x6   :  { %s816_s13 = smov 0   ;;  %s818_s14 = smov 0  }
   0x7 LB: > { %1009 = sst [smem:[#allocation11_spill]] %s780_s14  ;;  %s492_s15 = sadd.s32 4294967295, %s780_s14   ;;  %s780_s14 = sphi %s818_s14, %s1028_s14   ;;  %s776_s13 = sphi %s816_s13, %s1027_s13   ;;  %s772_s12 = sphi %s814_s12, %s1026_s12   ;;  %s768_s11 = sphi %s812_s11, %s1025_s11   ;;  %s764_s10 = sphi %s810_s10, %s1024_s10   ;;  %s760_s9 = sphi %s808_s9, %s1023_s9  }
   0x8   : > { %s493_s16 = sadd.s32 4294967294, %s780_s14   ;;  %p71_p0 = scmp.ne.s32.totalorder %s768_s11, %s764_s10 }
   0x9   : > { %p72_p1 = scmp.eq.s32.totalorder %s780_s14, 0  ;;  %p77_p2 = scmp.ne.s32.totalorder %s764_s10, %s760_s9 }
   0xa   : > { %p845_p3 = scmp.eq.s32.totalorder %s492_s15, 0  ;;  %p103_p5 = scmp.eq.s32.totalorder %s492_s15, 1 }
   0xb   : > { %p849_p4 = por %p72_p1, %p71_p0  ;;  %p109_p7 = scmp.eq.s32.totalorder %s493_s16, 1 }
   0xc   : > { %p855_p6 = por %p845_p3, %p77_p2  ;;  %p859_p8 = por %p103_p5, %p71_p0 }
   0xd   : > { %p494_p9 = scmp.ge.s32.totalorder %s780_s14, 1  ;;  %p864_p10 = por %p109_p7, %p77_p2 }
   0xe   : > { %s1012_s19 = scalar_select %p855_p6, 1, 0 }
   0xf   : > { %s1013_s20 = scalar_select %p859_p8, 1, 0 }
  0x10   : > { %s1014_s21 = scalar_select %p864_p10, 1, 0 }
  0x11   : > { %p116_p11 = scmp.lt.s32.totalorder %s780_s14, 3  ;;  %s782_s23 = smov [#allocation2]  }
  0x12   : > { %s132_s24 = sshll.u32 %s782_s23, 4  ;;  %p566_p1 = scmp.lt.s32.totalorder %s780_s14, 2  ;;  %s133_s24 = int_to_ptr.vmem [resolvable:$true] %s132_s24 }
  0x13   : > { %p869_p12 = pnand %p494_p9, %p116_p11  ;;  %s31_s27 = sadd.s32 1, %s776_s13 }
  0x14   : > { %p885_p2 = pnand %p566_p1, %p849_p4  ;;  %s653_s28 = scalar_lea.vmem %s133_s24, 512 }
  0x15   : > { %p553_p13 = pneg %p869_p12  ;;  %p654_p9 = scmp.ne.s32.totalorder %s133_s24, %s653_s28 }
  0x16   : > { %p661_p0 = scmp.lt.s32.totalorder %s133_s24, %s133_s24  ;;  %p662_p8 = scmp.lt.s32.totalorder %s653_s28, %s653_s28 }
  0x17   : > { %p879_p5 = pnand %p553_p13, %p845_p3 }
  0x18   : > { %p663_p6 = por %p662_p8, %p661_p0 }
  0x19   : > { %p644_p7 = pneg %p879_p5 }
  0x1b   : > { %p656_p11 = pnand %p654_p9, %p644_p7 }
  0x1d   : > { %p657_p10 = pneg %p656_p11 }
  0x1f   : > { %p664_p13 = pnand %p663_p6, %p657_p10 }
  0x21   : > { %667 = shalt.err (!%p664_p13)
}
  0x22   : > { %s783_s29 = smov 256   ;;  %s784_s30 = smov 16  }
  0x23   : > { %556 = dma.hbm_to_vmem [thread:$0]  (!%p879_p5), %s1002_s0, 512, %s133_s24, [#allocation3], %s783_s29, %s783_s29, %s784_s30  }
  0x24   : > { %p33_p4 = scmp.ge.s32.totalorder %s31_s27, 2  ;;  %s64_s5 = sadd.s32 1, %s768_s11 }
  0x25   : > { %s146_s6 = sand.u32 1, %s768_s11   ;;  %s498_s15 = sshll.u32 %s776_s13, 6 }
  0x26   : > { %s1030_s27 = smov (%p33_p4, %s31_s27), 0  ;;  %s497_s7 = sshll.u32 %s146_s6, 7 }
  0x27   : > { %s61_s8 = ssub.s32 %s776_s13, %s1030_s27  ;;  %s155_s23 = scalar_lea.hbm %s1003_s1, %s498_s15 }
  0x28   : > { %p62_p6 = scmp.eq.s32.totalorder %s61_s8, 0  ;;  %s150_s25 = scalar_lea.vmem [#allocation5], %s497_s7 }
  0x29   : > { %s156_s28 = sshll.u32 %s150_s25, 4  ;;  %s147_s24 = scalar_lea.sflag [#allocation6], %s146_s6  ;;  %s157_s28 = int_to_ptr.vmem [resolvable:$true] %s156_s28 }
  0x2a   : > { %s908_s14 = scalar_select %p62_p6, %s768_s11, %s64_s5  }
  0x2b   : > { %p670_p8 = pneg %p885_p2  ;;  %s681_s29 = scalar_lea.vmem %s157_s28, 2048 }
  0x2c   : > { %p682_p10 = scmp.ne.s32.totalorder %s157_s28, %s681_s29  ;;  %s785_s30 = smov [#allocation5]  }
  0x2d   : > { %s686_s3 = sshll.u32 %s785_s30, 4  ;;  %s687_s3 = int_to_ptr.vmem [resolvable:$false] %s686_s3 }
  0x2e   : > { %p684_p0 = pnand %p682_p10, %p670_p8  ;;  %s688_s4 = scalar_lea.vmem %s687_s3, 4096 }
  0x2f   : > { %p689_p5 = scmp.lt.s32.totalorder %s157_s28, %s687_s3  ;;  %p690_p7 = scmp.lt.s32.totalorder %s688_s4, %s681_s29 }
  0x30   : > { %p685_p1 = pneg %p684_p0 }
  0x31   : > { %p691_p9 = por %p690_p7, %p689_p5 }
  0x33   : > { %p692_p11 = pnand %p691_p9, %p685_p1 }
  0x35   : > { %695 = shalt.err (!%p692_p11)
}
  0x36   : > { %s786_s7 = smov 128   ;;  %s787_s5 = smov 64  }
  0x37   : > { %s788_s8 = smov 4   ;;  %168 = sbr.rel (%p869_p12) target bundleno = 314 (0x13a), region = 28 }
  0x38   : > { %560 = dma.hbm_to_vmem [thread:$0]  (!%p885_p2), %s155_s23, 2048, %s157_s28, %s147_s24, %s786_s7, %s787_s5, %s788_s8  }
  0x3c   : > { %747 = dma.done.wait (%p845_p3), [#allocation3], 512  }
  0x3d   : > { %749 = vsyncadd (%p845_p3), [#allocation3], 4294966784  ;;  %s921_s6 = sand.u32 1, %s764_s10   ;;  %p1018_p2 = scmp.ne.s32.totalorder %s1012_s19, 0 }
  0x3e   : > { %s501_s15 = sshll.u32 %s921_s6, 7  ;;  %s175_s16 = scalar_lea.sflag [#allocation6], %s921_s6 }
  0x3f   : > { %s925_s18 = scalar_lea.vmem [#allocation5], %s501_s15 }
  0x40   : > { %751 = dma.done.wait (%p1018_p2), %s175_s16, 2048  }
  0x41   : > { %753 = vsyncadd (%p1018_p2), %s175_s16, 4294965248  ;;  %v626_v0 = vld [vmem:[%s925_s18 + $0x78] sm:$0xff]   ;;  %v628_v2 = vld [vmem:[%s925_s18 + $0x70] sm:$0xff]   ;;  %s502_s17 = sshll.u32 %s921_s6, 4  ;;  %s520_s26 = sshll.u32 %s772_s12, 7 }
  0x42   : > { %v627_v1 = vld [vmem:[%s925_s18 + $0x38] sm:$0xff]   ;;  %523 = vmatprep.subr.bf16.mxu0 %v626_v0  ;;  %v629_v3 = vld [vmem:[%s925_s18 + $0x30] sm:$0xff]   ;;  %v630_v4 = vld [vmem:[%s925_s18 + $0x68] sm:$0xff]   ;;  %s198_s19 = scalar_lea.vmem [#allocation7], %s502_s17  ;;  %s954_s28 = scalar_lea.hbm %s1004_s2, %s520_s26 }
  0x43   : > { %524 = vmatpush3.bf16.msra.mxu0 %v627_v1  ;;  %v631_v5 = vld [vmem:[%s925_s18 + $0x28] sm:$0xff]   ;;  %v632_v6 = vld [vmem:[%s925_s18 + $0x60] sm:$0xff]   ;;  %v634_v8 = vld [vmem:[%s925_s18 + $0x58] sm:$0xff]   ;;  %s395_s22 = sshll.u32 %s198_s19, 4  ;;  %s380_s24 = scalar_lea.sflag [#allocation4], %s921_s6  ;;  %s949_s22 = int_to_ptr.vmem [resolvable:$true] %s395_s22 }
  0x44   : > { %525 = vmatprep.subr.bf16.mxu0 %v628_v2  ;;  %v633_v7 = vld [vmem:[%s925_s18 + $0x20] sm:$0xff]   ;;  %v635_v9 = vld [vmem:[%s925_s18 + $0x18] sm:$0xff]   ;;  %v636_v10 = vld [vmem:[%s925_s18 + $0x50] sm:$0xff]   ;;  %s696_s29 = scalar_lea.vmem %s949_s22, 256  ;;  %p1019_p12 = scmp.ne.s32.totalorder %s1013_s20, 0 }
  0x45   : > { %v203_v11 = vld [vmem:[#allocation2 + $0x8] sm:$0xff]  ;;  %v205_v12 = vld [vmem:[#allocation2 + $0x18] sm:$0xff]  ;;  %v637_v14 = vld [vmem:[%s925_s18 + $0x10] sm:$0xff]   ;;  %p697_p3 = scmp.ne.s32.totalorder %s949_s22, %s696_s29  ;;  %s789_s12 = smov [#allocation7]  }
  0x46   : > { %v207_v13 = vpack.c.bf16 %v205_v12, %v203_v11  ;;  %v638_v15 = vld [vmem:[%s925_s18 + $0x48] sm:$0xff]   ;;  %v640_v17 = vld [vmem:[%s925_s18 + $0x40] sm:$0xff]   ;;  %v204_v20 = vld [vmem:[#allocation2 + $0x10] sm:$0xff]  ;;  %s700_s30 = sshll.u32 %s789_s12, 4  ;;  %s701_s30 = int_to_ptr.vmem [resolvable:$false] %s700_s30 }
  0x47   : > { %526 = vmatpush3.bf16.msra.mxu0 %v629_v3  ;;  %v639_v16 = vld [vmem:[%s925_s18 + $0x8] sm:$0xff]   ;;  %v641_v18 = vld [vmem:[%s925_s18] sm:$0xff]   ;;  %p698_p13 = pnand %p697_p3, %p1019_p12  ;;  %s702_s3 = scalar_lea.vmem %s701_s30, 512 }
  0x48   : > { %527 = vmatprep.subr.bf16.mxu0 %v630_v4  ;;  %368 = vmatprep.mubr.bf16.mxu0 %v207_v13  ;;  %v202_v19 = vld [vmem:[#allocation2] sm:$0xff]  ;;  %p703_p6 = scmp.lt.s32.totalorder %s949_s22, %s701_s30  ;;  %p704_p8 = scmp.lt.s32.totalorder %s702_s3, %s696_s29 }
  0x49   : > { %v206_v21 = vpack.c.bf16 %v204_v20, %v202_v19  ;;  %p699_p4 = pneg %p698_p13 }
  0x4a   : > { %p705_p10 = por %p704_p8, %p703_p6 }
  0x4b   : > { %528 = vmatpush3.bf16.msra.mxu0 %v631_v5 }
  0x4c   : > { %529 = vmatprep.subr.bf16.mxu0 %v632_v6  ;;  %p706_p0 = pnand %p705_p10, %p699_p4 }
  0x4f   : > { %530 = vmatpush3.bf16.msra.mxu0 %v633_v7 }
  0x50   : > { %531 = vmatprep.subr.bf16.mxu0 %v634_v8 }
  0x53   : > { %532 = vmatpush3.bf16.msra.mxu0 %v635_v9 }
  0x54   : > { %533 = vmatprep.subr.bf16.mxu0 %v636_v10 }
  0x57   : > { %534 = vmatpush3.bf16.msra.mxu0 %v637_v14 }
  0x58   : > { %535 = vmatprep.subr.bf16.mxu0 %v638_v15 }
  0x5b   : > { %536 = vmatpush3.bf16.msra.mxu0 %v639_v16 }
  0x5c   : > { %537 = vmatprep.subr.bf16.mxu0 %v640_v17 }
  0x5f   : > { %538 = vmatpush3.bf16.msra.mxu0 %v641_v18 }
  0x62   : > { %369 = vmatmul.mubr.bf16.vlgmr.msra.gmra.mxu0 %v206_v21 }
 0x122   : > { %v539_v22 = vpop.f32.mrf.mxu0 }
 0x124   : > { %v540_v23 = vpop.f32.mrf.mxu0 }
 0x125   : > { %v541_v24 = vadd.f32 %v540_v23, %v539_v22 }
 0x126   : > { %v542_v25 = vpop.f32.mrf.mxu0 }
 0x127   : > { %377 = vst [vmem:[%s198_s19] sm:$0xff] %v541_v24 }
 0x128   : > { %v543_v26 = vpop.f32.mrf.mxu0 }
 0x129   : > { %v544_v27 = vadd.f32 %v543_v26, %v542_v25 }
 0x12b   : > { %378 = vst [vmem:[%s198_s19 + $0x8] sm:$0xff] %v544_v27 }
 0x12c   : > { %709 = shalt.err (!%p706_p0)
}
 0x12d   : > { %s710_s4 = scalar_lea.hbm %s954_s28, 256  ;;  %s714_s8 = scalar_lea.hbm %s1004_s2, 512 }
 0x12e   : > { %p711_p1 = scmp.ne.s32.totalorder %s954_s28, %s710_s4  ;;  %p715_p9 = scmp.lt.s32.totalorder %s954_s28, %s1004_s2 }
 0x12f   : > { %p716_p11 = scmp.lt.s32.totalorder %s714_s8, %s710_s4 }
 0x130   : > { %p712_p5 = pnand %p711_p1, %p1019_p12 }
 0x131   : > { %p717_p2 = por %p716_p11, %p715_p9 }
 0x132   : > { %p713_p7 = pneg %p712_p5 }
 0x134   : > { %p718_p3 = pnand %p717_p2, %p713_p7 }
 0x136   : > { %721 = shalt.err (!%p718_p3)
}
 0x137   : > { %s790_s18 = smov 128   ;;  %s791_s17 = smov 256  }
 0x138   : > { %s792_s19 = smov 8  }
 0x139   : > { %551 = dma.vmem_to_hbm [thread:$0]  (%p1019_p12), %s949_s22, 256, %s954_s28, %s380_s24, %s790_s18, %s791_s17, %s792_s19  }
 0x13a PF: > { %s1020_s26 = sld [smem:[#allocation11_spill]]  ;;  %s410_s23 = sand.u32 1, %s760_s9  }
 0x13b   : > { %p1021_p13 = scmp.ne.s32.totalorder %s1014_s21, 0  ;;  %s411_s25 = scalar_lea.sflag [#allocation4], %s410_s23 }
 0x140   : > { %p1022_p4 = scmp.ge.s32.totalorder %s1020_s26, 2 }
 0x142   : > { %p562_p6 = pnand %p1022_p4, %p1021_p13 }
 0x144   : > { %p563_p8 = pneg %p562_p6 }
 0x146   : > { %755 = dma.done.wait (%p563_p8), %s411_s25, 256  }
 0x147   : > { %757 = vsyncadd (%p563_p8), %s411_s25, 4294967040  ;;  %s19_s29 = sadd.s32 1, %s1020_s26   ;;  %s1023_s9 = smov %s764_s10 }
 0x148   : > { %p16_p10 = scmp.ge.s32.totalorder %s19_s29, 4   ;;  %s1024_s10 = smov %s768_s11 }
 0x149   : > { %s1025_s11 = smov %s908_s14  ;;  %s1026_s12 = smov %s776_s13 }
 0x14a   : > { %s1027_s13 = smov %s1030_s27  ;;  %s1028_s14 = smov %s19_s29 }
 0x14b   :  { %18 = sbr.rel (!%p16_p10) target bundleno = 7 (0x7), region = 79 }
 0x150   :  { %416 = vsyncpa [#allocation3], 1 }
 0x151   :  { %418 = vsyncpa [#allocation3 + $0x1], 1 }
 0x152   :  { %419 = vsyncpa [#allocation6], 1 }
 0x153   :  { %421 = vsyncpa [#allocation6 + $0x1], 1 }
 0x154   :  { %422 = vsyncpa [#allocation4], 1 }
 0x155   :  { %424 = vsyncpa [#allocation4 + $0x1], 1 }

</bundles_post_ra>
